<compile_context>
chip_gen: v7x
topology: tpu7x:2x2x1
jax: 0.10.0
libtpu: 0.0.40
codegen_flags: <defaults>
</compile_context>

<pallas_src>
import functools

import jax
import jax.numpy as jnp
from jax import lax
from jax.experimental import pallas as pl
from jax.experimental.pallas import tpu as pltpu


def _round_up(x, m):
    return ((x + m - 1) // m) * m


def pack_pose_params(params):
    """One-time packing of PyTorch-layout params into kernel-ready arrays.

    Call once (e.g. right after init / checkpoint load), NOT per forward call.
    """
    f32 = jnp.float32
    emb_tab = params["embedding"].astype(f32)   # (V, E)
    w_ih = params["w_ih"].astype(f32)           # (E, 4H)
    w_hh = params["w_hh"].astype(f32)           # (H, 4H)
    w_fc = params["w_fc"].astype(f32)           # (H, O)
    w_eos = params["w_eos"].astype(f32)         # (H, 1)

    H = w_hh.shape[0]
    O = w_fc.shape[1]
    G = 4 * H                       # raw gate width (i, f, g, o)
    G_PAD = _round_up(G, 128)       # lane-aligned gate block
    HEAD = _round_up(O + 1, 128)    # lane-dense fused pose+eos head block
    WTOT = G_PAD + HEAD

    # Pre-projected embedding table: row v holds embedding[v] @ W_ih (the
    # loop-invariant input contribution to the LSTM gates), zero-padded to G_PAD.
    gx_table = jnp.zeros((emb_tab.shape[0], G_PAD), f32)
    gx_table = gx_table.at[:, :G].set(emb_tab @ w_ih)

    # Fused recurrent + head weight: [ W_hh | pad | W_fc | W_eos | pad ].
    w_big = jnp.zeros((H, WTOT), f32)
    w_big = w_big.at[:, :G].set(w_hh)
    w_big = w_big.at[:, G_PAD:G_PAD + O].set(w_fc)
    w_big = w_big.at[:, G_PAD + O:G_PAD + O + 1].set(w_eos)

    # Fused bias: gate biases (b_ih + b_hh) | pad | b_fc | b_eos | pad.
    b_big = jnp.zeros((1, WTOT), f32)
    b_big = b_big.at[:, :G].set((params["b_ih"] + params["b_hh"]).astype(f32)[None, :])
    b_big = b_big.at[:, G_PAD:G_PAD + O].set(params["b_fc"].astype(f32)[None, :])
    b_big = b_big.at[:, G_PAD + O:G_PAD + O + 1].set(params["b_eos"].astype(f32)[None, :])

    return {"gx_table": gx_table, "w_big": w_big, "b_big": b_big}


@functools.partial(jax.jit, static_argnames=("output_dim", "max_seq_len"))
def pose_model_forward(packed, word_input, *, output_dim, max_seq_len=8):
    gx_table = packed["gx_table"]          # (V, G_PAD)
    w_big = packed["w_big"]                # (H, WTOT)
    b_big = packed["b_big"]                # (1, WTOT)

    B = word_input.shape[0]
    G_PAD = gx_table.shape[1]
    H, WTOT = w_big.shape
    HEAD = WTOT - G_PAD
    O = int(output_dim)
    T = int(max_seq_len)
    f32 = jnp.float32

    # Embedding gather, pre-projected through W_ih -> loop-invariant gate term.
    # Fused into the same jit as the pallas_call (single dispatch).
    gates_x = gx_table[word_input].astype(f32)          # (B, G_PAD)

    def kernel(gx_ref, wbig_ref, bbig_ref, out_ref):
        gx = gx_ref[...]                                             # (B, G_PAD)
        w = wbig_ref[...]                                            # (H, WTOT)
        # Hoisted out of the loop (JAX does not CSE broadcast_in_dim).
        b_bcast = jnp.broadcast_to(bbig_ref[...], (B, WTOT))         # (B, WTOT)
        col = lax.broadcasted_iota(jnp.int32, (B, HEAD), 1)

        # Recurrent state lives in registers (loop-carried values, no VMEM scratch).
        # h_0 = 0  =>  r_0 = 0 @ w_big + b_big = b_big ; c_0 = 0.
        r = b_bcast
        c = jnp.zeros((B, H), f32)

        # Fully static, unrolled decode loop: every store below is a static,
        # 128-aligned, 128-wide (unmasked) column block of the output slab.
        for t in range(T):
            gates = gx + r[:, :G_PAD]                                # (B, G_PAD)
            # NOTE: with H=32 the four 32-lane gate slices share one vreg; the
            # intra-vreg slicing cost is tiny at this size.
            i_g = jax.nn.sigmoid(gates[:, 0 * H:1 * H])
            f_g = jax.nn.sigmoid(gates[:, 1 * H:2 * H])
            g_g = jnp.tanh(gates[:, 2 * H:3 * H])
            o_g = jax.nn.sigmoid(gates[:, 3 * H:4 * H])
            c = f_g * c + i_g * g_g
            h = o_g * jnp.tanh(c)

            # Single fused MXU push per step:
            #   first G_PAD cols -> next step's recurrent gate pre-activations
            #   last HEAD cols   -> [pose_t | eos_logit_t | 0 ...] for this step
            r = jnp.dot(h, w, preferred_element_type=f32) + b_bcast  # (B, WTOT)

            head = r[:, G_PAD:]                                      # (B, HEAD)
            out_ref[:, t * HEAD:(t + 1) * HEAD] = jnp.where(
                col == O, jax.nn.sigmoid(head), head)

    out = pl.pallas_call(
        kernel,
        out_shape=jax.ShapeDtypeStruct((B, T * HEAD), f32),
        # No grid: everything resident in VMEM, no pipeline prologue/epilogue or
        # double buffering for these tiny operands.
        in_specs=[
            pl.BlockSpec(memory_space=pltpu.MemorySpace.VMEM),
            pl.BlockSpec(memory_space=pltpu.MemorySpace.VMEM),
            pl.BlockSpec(memory_space=pltpu.MemorySpace.VMEM),
        ],
        out_specs=pl.BlockSpec(memory_space=pltpu.MemorySpace.VMEM),
    )(gates_x, w_big, b_big)

    out = out.reshape(B, T, HEAD)
    outputs = out[:, :, :O]                  # (B, T, O)
    eos_predictions = out[:, :, O:O + 1]     # (B, T, 1)
    return outputs, eos_predictions


def _reference_forward(params, word_input, max_seq_len=8):
    """Pure-JAX reference mirroring the PyTorch forward (no early break)."""
    emb = params["embedding"][word_input]
    B = emb.shape[0]
    H = params["w_hh"].shape[0]
    h = jnp.zeros((B, H), jnp.float32)
    c = jnp.zeros((B, H), jnp.float32)
    bias = params["b_ih"] + params["b_hh"]
    outs, eoss = [], []
    for _ in range(max_seq_len):
        gates = emb @ params["w_ih"] + h @ params["w_hh"] + bias
        i_g = jax.nn.sigmoid(gates[:, 0 * H:1 * H])
        f_g = jax.nn.sigmoid(gates[:, 1 * H:2 * H])
        g_g = jnp.tanh(gates[:, 2 * H:3 * H])
        o_g = jax.nn.sigmoid(gates[:, 3 * H:4 * H])
        c = f_g * c + i_g * g_g
        h = o_g * jnp.tanh(c)
        outs.append(h @ params["w_fc"] + params["b_fc"])
        eoss.append(jax.nn.sigmoid(h @ params["w_eos"] + params["b_eos"]))
    return jnp.stack(outs, axis=1), jnp.stack(eoss, axis=1)


def init_params(key, vocab_size, embedding_dim, hidden_dim, output_dim):
    ks = jax.random.split(key, 9)
    s = 0.1
    f32 = jnp.float32
    return {
        "embedding": jax.random.normal(ks[0], (vocab_size, embedding_dim), f32) * s,
        "w_ih": jax.random.normal(ks[1], (embedding_dim, 4 * hidden_dim), f32) * s,
        "w_hh": jax.random.normal(ks[2], (hidden_dim, 4 * hidden_dim), f32) * s,
        "b_ih": jax.random.normal(ks[3], (4 * hidden_dim,), f32) * s,
        "b_hh": jax.random.normal(ks[4], (4 * hidden_dim,), f32) * s,
        "w_fc": jax.random.normal(ks[5], (hidden_dim, output_dim), f32) * s,
        "b_fc": jax.random.normal(ks[6], (output_dim,), f32) * s,
        "w_eos": jax.random.normal(ks[7], (hidden_dim, 1), f32) * s,
        "b_eos": jax.random.normal(ks[8], (1,), f32) * s,
    }


if __name__ == "__main__":
    vocab_size, embedding_dim, hidden_dim, output_dim = 50, 32, 32, 16
    batch, max_seq_len = 2, 8

    key = jax.random.PRNGKey(0)
    k_params, k_inp = jax.random.split(key)
    params = init_params(k_params, vocab_size, embedding_dim, hidden_dim, output_dim)
    word_input = jax.random.randint(k_inp, (batch,), 0, vocab_size, dtype=jnp.int32)

    # One-time packing (hoisted out of the per-call forward).
    packed = pack_pose_params(params)
    packed = jax.block_until_ready(packed)

    outputs, eos_predictions = pose_model_forward(
        packed, word_input, output_dim=output_dim, max_seq_len=max_seq_len)
    outputs = jax.block_until_ready(outputs)
    eos_predictions = jax.block_until_ready(eos_predictions)

    assert outputs.shape == (batch, max_seq_len, output_dim)
    assert eos_predictions.shape == (batch, max_seq_len, 1)

    ref_out, ref_eos = _reference_forward(params, word_input, max_seq_len)
    assert jnp.allclose(outputs, ref_out, atol=1e-4, rtol=1e-4)
    assert jnp.allclose(eos_predictions, ref_eos, atol=1e-4, rtol=1e-4)

    print("KERNEL_OK")
</pallas_src>

<mosaic_0001>
module attributes {stable_mosaic.version = 11 : i64} {
  func.func @kernel(%arg0: memref<2x128xf32, #tpu.memory_space<vmem>>, %arg1: memref<32x256xf32, #tpu.memory_space<vmem>>, %arg2: memref<1x256xf32, #tpu.memory_space<vmem>>, %arg3: memref<2x1024xf32, #tpu.memory_space<vmem>>) attributes {dimension_semantics = [], scalar_prefetch = 0 : i64, scratch_operands = 0 : i64, tpu.core_type = #tpu.core_type<tc>} {
    %c0 = arith.constant 0 : index
    %c0_0 = arith.constant 0 : index
    %0 = vector.load %arg0[%c0, %c0_0] : memref<2x128xf32, #tpu.memory_space<vmem>>, vector<2x128xf32>
    %c0_1 = arith.constant 0 : index
    %c0_2 = arith.constant 0 : index
    %1 = vector.load %arg1[%c0_1, %c0_2] : memref<32x256xf32, #tpu.memory_space<vmem>>, vector<32x256xf32>
    %c0_3 = arith.constant 0 : index
    %c0_4 = arith.constant 0 : index
    %2 = vector.load %arg2[%c0_3, %c0_4] : memref<1x256xf32, #tpu.memory_space<vmem>>, vector<1x256xf32>
    %3 = vector.shape_cast %2 : vector<1x256xf32> to vector<1x256xf32>
    %4 = vector.broadcast %3 : vector<1x256xf32> to vector<2x256xf32>
    %5 = tpu.iota {dimensions = array<i32: 1>} : vector<2x128xi32>
    %cst = arith.constant 0.000000e+00 : f32
    %6 = vector.broadcast %cst : f32 to vector<2x32xf32>
    %7 = vector.extract_strided_slice %4 {offsets = [0, 0], sizes = [2, 128], strides = [1, 1]} : vector<2x256xf32> to vector<2x128xf32>
    %8 = arith.addf %0, %7 : vector<2x128xf32>
    %9 = vector.extract_strided_slice %8 {offsets = [0, 0], sizes = [2, 32], strides = [1, 1]} : vector<2x128xf32> to vector<2x32xf32>
    %10 = arith.negf %9 : vector<2x32xf32>
    %11 = math.exp %10 : vector<2x32xf32>
    %cst_5 = arith.constant 1.000000e+00 : f32
    %12 = vector.broadcast %cst_5 : f32 to vector<2x32xf32>
    %13 = arith.addf %12, %11 : vector<2x32xf32>
    %14 = arith.divf %12, %13 : vector<2x32xf32>
    %15 = vector.extract_strided_slice %8 {offsets = [0, 32], sizes = [2, 32], strides = [1, 1]} : vector<2x128xf32> to vector<2x32xf32>
    %16 = arith.negf %15 : vector<2x32xf32>
    %17 = math.exp %16 : vector<2x32xf32>
    %cst_6 = arith.constant 1.000000e+00 : f32
    %18 = vector.broadcast %cst_6 : f32 to vector<2x32xf32>
    %19 = arith.addf %18, %17 : vector<2x32xf32>
    %20 = arith.divf %18, %19 : vector<2x32xf32>
    %21 = vector.extract_strided_slice %8 {offsets = [0, 64], sizes = [2, 32], strides = [1, 1]} : vector<2x128xf32> to vector<2x32xf32>
    %22 = math.tanh %21 : vector<2x32xf32>
    %23 = vector.extract_strided_slice %8 {offsets = [0, 96], sizes = [2, 32], strides = [1, 1]} : vector<2x128xf32> to vector<2x32xf32>
    %24 = arith.negf %23 : vector<2x32xf32>
    %25 = math.exp %24 : vector<2x32xf32>
    %cst_7 = arith.constant 1.000000e+00 : f32
    %26 = vector.broadcast %cst_7 : f32 to vector<2x32xf32>
    %27 = arith.addf %26, %25 : vector<2x32xf32>
    %28 = arith.divf %26, %27 : vector<2x32xf32>
    %29 = arith.mulf %20, %6 : vector<2x32xf32>
    %30 = arith.mulf %14, %22 : vector<2x32xf32>
    %31 = arith.addf %29, %30 : vector<2x32xf32>
    %32 = math.tanh %31 : vector<2x32xf32>
    %33 = arith.mulf %28, %32 : vector<2x32xf32>
    %cst_8 = arith.constant dense<0.000000e+00> : vector<2x256xf32>
    %34 = tpu.matmul %33, %1, %cst_8 {dimension_numbers = #tpu.dot_dimension_numbers<[1], [0], [0], [1], [0, 0, 1, 1], [], []>} : vector<2x32xf32>, vector<32x256xf32>, vector<2x256xf32> -> vector<2x256xf32>
    %35 = arith.addf %34, %4 : vector<2x256xf32>
    %36 = vector.extract_strided_slice %35 {offsets = [0, 128], sizes = [2, 128], strides = [1, 1]} : vector<2x256xf32> to vector<2x128xf32>
    %c16_i32 = arith.constant 16 : i32
    %37 = vector.broadcast %c16_i32 : i32 to vector<2x128xi32>
    %38 = arith.cmpi eq, %5, %37 : vector<2x128xi32>
    %39 = arith.negf %36 : vector<2x128xf32>
    %40 = math.exp %39 : vector<2x128xf32>
    %cst_9 = arith.constant 1.000000e+00 : f32
    %41 = vector.broadcast %cst_9 : f32 to vector<2x128xf32>
    %42 = arith.addf %41, %40 : vector<2x128xf32>
    %43 = arith.divf %41, %42 : vector<2x128xf32>
    %44 = arith.select %38, %43, %36 : vector<2x128xi1>, vector<2x128xf32>
    %c0_10 = arith.constant 0 : index
    %c0_11 = arith.constant 0 : index
    %45 = vector.load %arg3[%c0_10, %c0_11] : memref<2x1024xf32, #tpu.memory_space<vmem>>, vector<2x128xf32>
    tpu.vector_store %arg3[%c0_10, %c0_11], %44 {strides = array<i32>} : memref<2x1024xf32, #tpu.memory_space<vmem>>, vector<2x128xf32>,
    %46 = vector.extract_strided_slice %35 {offsets = [0, 0], sizes = [2, 128], strides = [1, 1]} : vector<2x256xf32> to vector<2x128xf32>
    %47 = arith.addf %0, %46 : vector<2x128xf32>
    %48 = vector.extract_strided_slice %47 {offsets = [0, 0], sizes = [2, 32], strides = [1, 1]} : vector<2x128xf32> to vector<2x32xf32>
    %49 = arith.negf %48 : vector<2x32xf32>
    %50 = math.exp %49 : vector<2x32xf32>
    %cst_12 = arith.constant 1.000000e+00 : f32
    %51 = vector.broadcast %cst_12 : f32 to vector<2x32xf32>
    %52 = arith.addf %51, %50 : vector<2x32xf32>
    %53 = arith.divf %51, %52 : vector<2x32xf32>
    %54 = vector.extract_strided_slice %47 {offsets = [0, 32], sizes = [2, 32], strides = [1, 1]} : vector<2x128xf32> to vector<2x32xf32>
    %55 = arith.negf %54 : vector<2x32xf32>
    %56 = math.exp %55 : vector<2x32xf32>
    %cst_13 = arith.constant 1.000000e+00 : f32
    %57 = vector.broadcast %cst_13 : f32 to vector<2x32xf32>
    %58 = arith.addf %57, %56 : vector<2x32xf32>
    %59 = arith.divf %57, %58 : vector<2x32xf32>
    %60 = vector.extract_strided_slice %47 {offsets = [0, 64], sizes = [2, 32], strides = [1, 1]} : vector<2x128xf32> to vector<2x32xf32>
    %61 = math.tanh %60 : vector<2x32xf32>
    %62 = vector.extract_strided_slice %47 {offsets = [0, 96], sizes = [2, 32], strides = [1, 1]} : vector<2x128xf32> to vector<2x32xf32>
    %63 = arith.negf %62 : vector<2x32xf32>
    %64 = math.exp %63 : vector<2x32xf32>
    %cst_14 = arith.constant 1.000000e+00 : f32
    %65 = vector.broadcast %cst_14 : f32 to vector<2x32xf32>
    %66 = arith.addf %65, %64 : vector<2x32xf32>
    %67 = arith.divf %65, %66 : vector<2x32xf32>
    %68 = arith.mulf %59, %31 : vector<2x32xf32>
    %69 = arith.mulf %53, %61 : vector<2x32xf32>
    %70 = arith.addf %68, %69 : vector<2x32xf32>
    %71 = math.tanh %70 : vector<2x32xf32>
    %72 = arith.mulf %67, %71 : vector<2x32xf32>
    %cst_15 = arith.constant dense<0.000000e+00> : vector<2x256xf32>
    %73 = tpu.matmul %72, %1, %cst_15 {dimension_numbers = #tpu.dot_dimension_numbers<[1], [0], [0], [1], [0, 0, 1, 1], [], []>} : vector<2x32xf32>, vector<32x256xf32>, vector<2x256xf32> -> vector<2x256xf32>
    %74 = arith.addf %73, %4 : vector<2x256xf32>
    %75 = vector.extract_strided_slice %74 {offsets = [0, 128], sizes = [2, 128], strides = [1, 1]} : vector<2x256xf32> to vector<2x128xf32>
    %c16_i32_16 = arith.constant 16 : i32
    %76 = vector.broadcast %c16_i32_16 : i32 to vector<2x128xi32>
    %77 = arith.cmpi eq, %5, %76 : vector<2x128xi32>
    %78 = arith.negf %75 : vector<2x128xf32>
    %79 = math.exp %78 : vector<2x128xf32>
    %cst_17 = arith.constant 1.000000e+00 : f32
    %80 = vector.broadcast %cst_17 : f32 to vector<2x128xf32>
    %81 = arith.addf %80, %79 : vector<2x128xf32>
    %82 = arith.divf %80, %81 : vector<2x128xf32>
    %83 = arith.select %77, %82, %75 : vector<2x128xi1>, vector<2x128xf32>
    %c0_18 = arith.constant 0 : index
    %c128 = arith.constant 128 : index
    %84 = vector.load %arg3[%c0_18, %c128] : memref<2x1024xf32, #tpu.memory_space<vmem>>, vector<2x128xf32>
    tpu.vector_store %arg3[%c0_18, %c128], %83 {strides = array<i32>} : memref<2x1024xf32, #tpu.memory_space<vmem>>, vector<2x128xf32>,
    %85 = vector.extract_strided_slice %74 {offsets = [0, 0], sizes = [2, 128], strides = [1, 1]} : vector<2x256xf32> to vector<2x128xf32>
    %86 = arith.addf %0, %85 : vector<2x128xf32>
    %87 = vector.extract_strided_slice %86 {offsets = [0, 0], sizes = [2, 32], strides = [1, 1]} : vector<2x128xf32> to vector<2x32xf32>
    %88 = arith.negf %87 : vector<2x32xf32>
    %89 = math.exp %88 : vector<2x32xf32>
    %cst_19 = arith.constant 1.000000e+00 : f32
    %90 = vector.broadcast %cst_19 : f32 to vector<2x32xf32>
    %91 = arith.addf %90, %89 : vector<2x32xf32>
    %92 = arith.divf %90, %91 : vector<2x32xf32>
    %93 = vector.extract_strided_slice %86 {offsets = [0, 32], sizes = [2, 32], strides = [1, 1]} : vector<2x128xf32> to vector<2x32xf32>
    %94 = arith.negf %93 : vector<2x32xf32>
    %95 = math.exp %94 : vector<2x32xf32>
    %cst_20 = arith.constant 1.000000e+00 : f32
    %96 = vector.broadcast %cst_20 : f32 to vector<2x32xf32>
    %97 = arith.addf %96, %95 : vector<2x32xf32>
    %98 = arith.divf %96, %97 : vector<2x32xf32>
    %99 = vector.extract_strided_slice %86 {offsets = [0, 64], sizes = [2, 32], strides = [1, 1]} : vector<2x128xf32> to vector<2x32xf32>
    %100 = math.tanh %99 : vector<2x32xf32>
    %101 = vector.extract_strided_slice %86 {offsets = [0, 96], sizes = [2, 32], strides = [1, 1]} : vector<2x128xf32> to vector<2x32xf32>
    %102 = arith.negf %101 : vector<2x32xf32>
    %103 = math.exp %102 : vector<2x32xf32>
    %cst_21 = arith.constant 1.000000e+00 : f32
    %104 = vector.broadcast %cst_21 : f32 to vector<2x32xf32>
    %105 = arith.addf %104, %103 : vector<2x32xf32>
    %106 = arith.divf %104, %105 : vector<2x32xf32>
    %107 = arith.mulf %98, %70 : vector<2x32xf32>
    %108 = arith.mulf %92, %100 : vector<2x32xf32>
    %109 = arith.addf %107, %108 : vector<2x32xf32>
    %110 = math.tanh %109 : vector<2x32xf32>
    %111 = arith.mulf %106, %110 : vector<2x32xf32>
    %cst_22 = arith.constant dense<0.000000e+00> : vector<2x256xf32>
    %112 = tpu.matmul %111, %1, %cst_22 {dimension_numbers = #tpu.dot_dimension_numbers<[1], [0], [0], [1], [0, 0, 1, 1], [], []>} : vector<2x32xf32>, vector<32x256xf32>, vector<2x256xf32> -> vector<2x256xf32>
    %113 = arith.addf %112, %4 : vector<2x256xf32>
    %114 = vector.extract_strided_slice %113 {offsets = [0, 128], sizes = [2, 128], strides = [1, 1]} : vector<2x256xf32> to vector<2x128xf32>
    %c16_i32_23 = arith.constant 16 : i32
    %115 = vector.broadcast %c16_i32_23 : i32 to vector<2x128xi32>
    %116 = arith.cmpi eq, %5, %115 : vector<2x128xi32>
    %117 = arith.negf %114 : vector<2x128xf32>
    %118 = math.exp %117 : vector<2x128xf32>
    %cst_24 = arith.constant 1.000000e+00 : f32
    %119 = vector.broadcast %cst_24 : f32 to vector<2x128xf32>
    %120 = arith.addf %119, %118 : vector<2x128xf32>
    %121 = arith.divf %119, %120 : vector<2x128xf32>
    %122 = arith.select %116, %121, %114 : vector<2x128xi1>, vector<2x128xf32>
    %c0_25 = arith.constant 0 : index
    %c256 = arith.constant 256 : index
    %123 = vector.load %arg3[%c0_25, %c256] : memref<2x1024xf32, #tpu.memory_space<vmem>>, vector<2x128xf32>
    tpu.vector_store %arg3[%c0_25, %c256], %122 {strides = array<i32>} : memref<2x1024xf32, #tpu.memory_space<vmem>>, vector<2x128xf32>,
    %124 = vector.extract_strided_slice %113 {offsets = [0, 0], sizes = [2, 128], strides = [1, 1]} : vector<2x256xf32> to vector<2x128xf32>
    %125 = arith.addf %0, %124 : vector<2x128xf32>
    %126 = vector.extract_strided_slice %125 {offsets = [0, 0], sizes = [2, 32], strides = [1, 1]} : vector<2x128xf32> to vector<2x32xf32>
    %127 = arith.negf %126 : vector<2x32xf32>
    %128 = math.exp %127 : vector<2x32xf32>
    %cst_26 = arith.constant 1.000000e+00 : f32
    %129 = vector.broadcast %cst_26 : f32 to vector<2x32xf32>
    %130 = arith.addf %129, %128 : vector<2x32xf32>
    %131 = arith.divf %129, %130 : vector<2x32xf32>
    %132 = vector.extract_strided_slice %125 {offsets = [0, 32], sizes = [2, 32], strides = [1, 1]} : vector<2x128xf32> to vector<2x32xf32>
    %133 = arith.negf %132 : vector<2x32xf32>
    %134 = math.exp %133 : vector<2x32xf32>
    %cst_27 = arith.constant 1.000000e+00 : f32
    %135 = vector.broadcast %cst_27 : f32 to vector<2x32xf32>
    %136 = arith.addf %135, %134 : vector<2x32xf32>
    %137 = arith.divf %135, %136 : vector<2x32xf32>
    %138 = vector.extract_strided_slice %125 {offsets = [0, 64], sizes = [2, 32], strides = [1, 1]} : vector<2x128xf32> to vector<2x32xf32>
    %139 = math.tanh %138 : vector<2x32xf32>
    %140 = vector.extract_strided_slice %125 {offsets = [0, 96], sizes = [2, 32], strides = [1, 1]} : vector<2x128xf32> to vector<2x32xf32>
    %141 = arith.negf %140 : vector<2x32xf32>
    %142 = math.exp %141 : vector<2x32xf32>
    %cst_28 = arith.constant 1.000000e+00 : f32
    %143 = vector.broadcast %cst_28 : f32 to vector<2x32xf32>
    %144 = arith.addf %143, %142 : vector<2x32xf32>
    %145 = arith.divf %143, %144 : vector<2x32xf32>
    %146 = arith.mulf %137, %109 : vector<2x32xf32>
    %147 = arith.mulf %131, %139 : vector<2x32xf32>
    %148 = arith.addf %146, %147 : vector<2x32xf32>
    %149 = math.tanh %148 : vector<2x32xf32>
    %150 = arith.mulf %145, %149 : vector<2x32xf32>
    %cst_29 = arith.constant dense<0.000000e+00> : vector<2x256xf32>
    %151 = tpu.matmul %150, %1, %cst_29 {dimension_numbers = #tpu.dot_dimension_numbers<[1], [0], [0], [1], [0, 0, 1, 1], [], []>} : vector<2x32xf32>, vector<32x256xf32>, vector<2x256xf32> -> vector<2x256xf32>
    %152 = arith.addf %151, %4 : vector<2x256xf32>
    %153 = vector.extract_strided_slice %152 {offsets = [0, 128], sizes = [2, 128], strides = [1, 1]} : vector<2x256xf32> to vector<2x128xf32>
    %c16_i32_30 = arith.constant 16 : i32
    %154 = vector.broadcast %c16_i32_30 : i32 to vector<2x128xi32>
    %155 = arith.cmpi eq, %5, %154 : vector<2x128xi32>
    %156 = arith.negf %153 : vector<2x128xf32>
    %157 = math.exp %156 : vector<2x128xf32>
    %cst_31 = arith.constant 1.000000e+00 : f32
    %158 = vector.broadcast %cst_31 : f32 to vector<2x128xf32>
    %159 = arith.addf %158, %157 : vector<2x128xf32>
    %160 = arith.divf %158, %159 : vector<2x128xf32>
    %161 = arith.select %155, %160, %153 : vector<2x128xi1>, vector<2x128xf32>
    %c0_32 = arith.constant 0 : index
    %c384 = arith.constant 384 : index
    %162 = vector.load %arg3[%c0_32, %c384] : memref<2x1024xf32, #tpu.memory_space<vmem>>, vector<2x128xf32>
    tpu.vector_store %arg3[%c0_32, %c384], %161 {strides = array<i32>} : memref<2x1024xf32, #tpu.memory_space<vmem>>, vector<2x128xf32>,
    %163 = vector.extract_strided_slice %152 {offsets = [0, 0], sizes = [2, 128], strides = [1, 1]} : vector<2x256xf32> to vector<2x128xf32>
    %164 = arith.addf %0, %163 : vector<2x128xf32>
    %165 = vector.extract_strided_slice %164 {offsets = [0, 0], sizes = [2, 32], strides = [1, 1]} : vector<2x128xf32> to vector<2x32xf32>
    %166 = arith.negf %165 : vector<2x32xf32>
    %167 = math.exp %166 : vector<2x32xf32>
    %cst_33 = arith.constant 1.000000e+00 : f32
    %168 = vector.broadcast %cst_33 : f32 to vector<2x32xf32>
    %169 = arith.addf %168, %167 : vector<2x32xf32>
    %170 = arith.divf %168, %169 : vector<2x32xf32>
    %171 = vector.extract_strided_slice %164 {offsets = [0, 32], sizes = [2, 32], strides = [1, 1]} : vector<2x128xf32> to vector<2x32xf32>
    %172 = arith.negf %171 : vector<2x32xf32>
    %173 = math.exp %172 : vector<2x32xf32>
    %cst_34 = arith.constant 1.000000e+00 : f32
    %174 = vector.broadcast %cst_34 : f32 to vector<2x32xf32>
    %175 = arith.addf %174, %173 : vector<2x32xf32>
    %176 = arith.divf %174, %175 : vector<2x32xf32>
    %177 = vector.extract_strided_slice %164 {offsets = [0, 64], sizes = [2, 32], strides = [1, 1]} : vector<2x128xf32> to vector<2x32xf32>
    %178 = math.tanh %177 : vector<2x32xf32>
    %179 = vector.extract_strided_slice %164 {offsets = [0, 96], sizes = [2, 32], strides = [1, 1]} : vector<2x128xf32> to vector<2x32xf32>
    %180 = arith.negf %179 : vector<2x32xf32>
    %181 = math.exp %180 : vector<2x32xf32>
    %cst_35 = arith.constant 1.000000e+00 : f32
    %182 = vector.broadcast %cst_35 : f32 to vector<2x32xf32>
    %183 = arith.addf %182, %181 : vector<2x32xf32>
    %184 = arith.divf %182, %183 : vector<2x32xf32>
    %185 = arith.mulf %176, %148 : vector<2x32xf32>
    %186 = arith.mulf %170, %178 : vector<2x32xf32>
    %187 = arith.addf %185, %186 : vector<2x32xf32>
    %188 = math.tanh %187 : vector<2x32xf32>
    %189 = arith.mulf %184, %188 : vector<2x32xf32>
    %cst_36 = arith.constant dense<0.000000e+00> : vector<2x256xf32>
    %190 = tpu.matmul %189, %1, %cst_36 {dimension_numbers = #tpu.dot_dimension_numbers<[1], [0], [0], [1], [0, 0, 1, 1], [], []>} : vector<2x32xf32>, vector<32x256xf32>, vector<2x256xf32> -> vector<2x256xf32>
    %191 = arith.addf %190, %4 : vector<2x256xf32>
    %192 = vector.extract_strided_slice %191 {offsets = [0, 128], sizes = [2, 128], strides = [1, 1]} : vector<2x256xf32> to vector<2x128xf32>
    %c16_i32_37 = arith.constant 16 : i32
    %193 = vector.broadcast %c16_i32_37 : i32 to vector<2x128xi32>
    %194 = arith.cmpi eq, %5, %193 : vector<2x128xi32>
    %195 = arith.negf %192 : vector<2x128xf32>
    %196 = math.exp %195 : vector<2x128xf32>
    %cst_38 = arith.constant 1.000000e+00 : f32
    %197 = vector.broadcast %cst_38 : f32 to vector<2x128xf32>
    %198 = arith.addf %197, %196 : vector<2x128xf32>
    %199 = arith.divf %197, %198 : vector<2x128xf32>
    %200 = arith.select %194, %199, %192 : vector<2x128xi1>, vector<2x128xf32>
    %c0_39 = arith.constant 0 : index
    %c512 = arith.constant 512 : index
    %201 = vector.load %arg3[%c0_39, %c512] : memref<2x1024xf32, #tpu.memory_space<vmem>>, vector<2x128xf32>
    tpu.vector_store %arg3[%c0_39, %c512], %200 {strides = array<i32>} : memref<2x1024xf32, #tpu.memory_space<vmem>>, vector<2x128xf32>,
    %202 = vector.extract_strided_slice %191 {offsets = [0, 0], sizes = [2, 128], strides = [1, 1]} : vector<2x256xf32> to vector<2x128xf32>
    %203 = arith.addf %0, %202 : vector<2x128xf32>
    %204 = vector.extract_strided_slice %203 {offsets = [0, 0], sizes = [2, 32], strides = [1, 1]} : vector<2x128xf32> to vector<2x32xf32>
    %205 = arith.negf %204 : vector<2x32xf32>
    %206 = math.exp %205 : vector<2x32xf32>
    %cst_40 = arith.constant 1.000000e+00 : f32
    %207 = vector.broadcast %cst_40 : f32 to vector<2x32xf32>
    %208 = arith.addf %207, %206 : vector<2x32xf32>
    %209 = arith.divf %207, %208 : vector<2x32xf32>
    %210 = vector.extract_strided_slice %203 {offsets = [0, 32], sizes = [2, 32], strides = [1, 1]} : vector<2x128xf32> to vector<2x32xf32>
    %211 = arith.negf %210 : vector<2x32xf32>
    %212 = math.exp %211 : vector<2x32xf32>
    %cst_41 = arith.constant 1.000000e+00 : f32
    %213 = vector.broadcast %cst_41 : f32 to vector<2x32xf32>
    %214 = arith.addf %213, %212 : vector<2x32xf32>
    %215 = arith.divf %213, %214 : vector<2x32xf32>
    %216 = vector.extract_strided_slice %203 {offsets = [0, 64], sizes = [2, 32], strides = [1, 1]} : vector<2x128xf32> to vector<2x32xf32>
    %217 = math.tanh %216 : vector<2x32xf32>
    %218 = vector.extract_strided_slice %203 {offsets = [0, 96], sizes = [2, 32], strides = [1, 1]} : vector<2x128xf32> to vector<2x32xf32>
    %219 = arith.negf %218 : vector<2x32xf32>
    %220 = math.exp %219 : vector<2x32xf32>
    %cst_42 = arith.constant 1.000000e+00 : f32
    %221 = vector.broadcast %cst_42 : f32 to vector<2x32xf32>
    %222 = arith.addf %221, %220 : vector<2x32xf32>
    %223 = arith.divf %221, %222 : vector<2x32xf32>
    %224 = arith.mulf %215, %187 : vector<2x32xf32>
    %225 = arith.mulf %209, %217 : vector<2x32xf32>
    %226 = arith.addf %224, %225 : vector<2x32xf32>
    %227 = math.tanh %226 : vector<2x32xf32>
    %228 = arith.mulf %223, %227 : vector<2x32xf32>
    %cst_43 = arith.constant dense<0.000000e+00> : vector<2x256xf32>
    %229 = tpu.matmul %228, %1, %cst_43 {dimension_numbers = #tpu.dot_dimension_numbers<[1], [0], [0], [1], [0, 0, 1, 1], [], []>} : vector<2x32xf32>, vector<32x256xf32>, vector<2x256xf32> -> vector<2x256xf32>
    %230 = arith.addf %229, %4 : vector<2x256xf32>
    %231 = vector.extract_strided_slice %230 {offsets = [0, 128], sizes = [2, 128], strides = [1, 1]} : vector<2x256xf32> to vector<2x128xf32>
    %c16_i32_44 = arith.constant 16 : i32
    %232 = vector.broadcast %c16_i32_44 : i32 to vector<2x128xi32>
    %233 = arith.cmpi eq, %5, %232 : vector<2x128xi32>
    %234 = arith.negf %231 : vector<2x128xf32>
    %235 = math.exp %234 : vector<2x128xf32>
    %cst_45 = arith.constant 1.000000e+00 : f32
    %236 = vector.broadcast %cst_45 : f32 to vector<2x128xf32>
    %237 = arith.addf %236, %235 : vector<2x128xf32>
    %238 = arith.divf %236, %237 : vector<2x128xf32>
    %239 = arith.select %233, %238, %231 : vector<2x128xi1>, vector<2x128xf32>
    %c0_46 = arith.constant 0 : index
    %c640 = arith.constant 640 : index
    %240 = vector.load %arg3[%c0_46, %c640] : memref<2x1024xf32, #tpu.memory_space<vmem>>, vector<2x128xf32>
    tpu.vector_store %arg3[%c0_46, %c640], %239 {strides = array<i32>} : memref<2x1024xf32, #tpu.memory_space<vmem>>, vector<2x128xf32>,
    %241 = vector.extract_strided_slice %230 {offsets = [0, 0], sizes = [2, 128], strides = [1, 1]} : vector<2x256xf32> to vector<2x128xf32>
    %242 = arith.addf %0, %241 : vector<2x128xf32>
    %243 = vector.extract_strided_slice %242 {offsets = [0, 0], sizes = [2, 32], strides = [1, 1]} : vector<2x128xf32> to vector<2x32xf32>
    %244 = arith.negf %243 : vector<2x32xf32>
    %245 = math.exp %244 : vector<2x32xf32>
    %cst_47 = arith.constant 1.000000e+00 : f32
    %246 = vector.broadcast %cst_47 : f32 to vector<2x32xf32>
    %247 = arith.addf %246, %245 : vector<2x32xf32>
    %248 = arith.divf %246, %247 : vector<2x32xf32>
    %249 = vector.extract_strided_slice %242 {offsets = [0, 32], sizes = [2, 32], strides = [1, 1]} : vector<2x128xf32> to vector<2x32xf32>
    %250 = arith.negf %249 : vector<2x32xf32>
    %251 = math.exp %250 : vector<2x32xf32>
    %cst_48 = arith.constant 1.000000e+00 : f32
    %252 = vector.broadcast %cst_48 : f32 to vector<2x32xf32>
    %253 = arith.addf %252, %251 : vector<2x32xf32>
    %254 = arith.divf %252, %253 : vector<2x32xf32>
    %255 = vector.extract_strided_slice %242 {offsets = [0, 64], sizes = [2, 32], strides = [1, 1]} : vector<2x128xf32> to vector<2x32xf32>
    %256 = math.tanh %255 : vector<2x32xf32>
    %257 = vector.extract_strided_slice %242 {offsets = [0, 96], sizes = [2, 32], strides = [1, 1]} : vector<2x128xf32> to vector<2x32xf32>
    %258 = arith.negf %257 : vector<2x32xf32>
    %259 = math.exp %258 : vector<2x32xf32>
    %cst_49 = arith.constant 1.000000e+00 : f32
    %260 = vector.broadcast %cst_49 : f32 to vector<2x32xf32>
    %261 = arith.addf %260, %259 : vector<2x32xf32>
    %262 = arith.divf %260, %261 : vector<2x32xf32>
    %263 = arith.mulf %254, %226 : vector<2x32xf32>
    %264 = arith.mulf %248, %256 : vector<2x32xf32>
    %265 = arith.addf %263, %264 : vector<2x32xf32>
    %266 = math.tanh %265 : vector<2x32xf32>
    %267 = arith.mulf %262, %266 : vector<2x32xf32>
    %cst_50 = arith.constant dense<0.000000e+00> : vector<2x256xf32>
    %268 = tpu.matmul %267, %1, %cst_50 {dimension_numbers = #tpu.dot_dimension_numbers<[1], [0], [0], [1], [0, 0, 1, 1], [], []>} : vector<2x32xf32>, vector<32x256xf32>, vector<2x256xf32> -> vector<2x256xf32>
    %269 = arith.addf %268, %4 : vector<2x256xf32>
    %270 = vector.extract_strided_slice %269 {offsets = [0, 128], sizes = [2, 128], strides = [1, 1]} : vector<2x256xf32> to vector<2x128xf32>
    %c16_i32_51 = arith.constant 16 : i32
    %271 = vector.broadcast %c16_i32_51 : i32 to vector<2x128xi32>
    %272 = arith.cmpi eq, %5, %271 : vector<2x128xi32>
    %273 = arith.negf %270 : vector<2x128xf32>
    %274 = math.exp %273 : vector<2x128xf32>
    %cst_52 = arith.constant 1.000000e+00 : f32
    %275 = vector.broadcast %cst_52 : f32 to vector<2x128xf32>
    %276 = arith.addf %275, %274 : vector<2x128xf32>
    %277 = arith.divf %275, %276 : vector<2x128xf32>
    %278 = arith.select %272, %277, %270 : vector<2x128xi1>, vector<2x128xf32>
    %c0_53 = arith.constant 0 : index
    %c768 = arith.constant 768 : index
    %279 = vector.load %arg3[%c0_53, %c768] : memref<2x1024xf32, #tpu.memory_space<vmem>>, vector<2x128xf32>
    tpu.vector_store %arg3[%c0_53, %c768], %278 {strides = array<i32>} : memref<2x1024xf32, #tpu.memory_space<vmem>>, vector<2x128xf32>,
    %280 = vector.extract_strided_slice %269 {offsets = [0, 0], sizes = [2, 128], strides = [1, 1]} : vector<2x256xf32> to vector<2x128xf32>
    %281 = arith.addf %0, %280 : vector<2x128xf32>
    %282 = vector.extract_strided_slice %281 {offsets = [0, 0], sizes = [2, 32], strides = [1, 1]} : vector<2x128xf32> to vector<2x32xf32>
    %283 = arith.negf %282 : vector<2x32xf32>
    %284 = math.exp %283 : vector<2x32xf32>
    %cst_54 = arith.constant 1.000000e+00 : f32
    %285 = vector.broadcast %cst_54 : f32 to vector<2x32xf32>
    %286 = arith.addf %285, %284 : vector<2x32xf32>
    %287 = arith.divf %285, %286 : vector<2x32xf32>
    %288 = vector.extract_strided_slice %281 {offsets = [0, 32], sizes = [2, 32], strides = [1, 1]} : vector<2x128xf32> to vector<2x32xf32>
    %289 = arith.negf %288 : vector<2x32xf32>
    %290 = math.exp %289 : vector<2x32xf32>
    %cst_55 = arith.constant 1.000000e+00 : f32
    %291 = vector.broadcast %cst_55 : f32 to vector<2x32xf32>
    %292 = arith.addf %291, %290 : vector<2x32xf32>
    %293 = arith.divf %291, %292 : vector<2x32xf32>
    %294 = vector.extract_strided_slice %281 {offsets = [0, 64], sizes = [2, 32], strides = [1, 1]} : vector<2x128xf32> to vector<2x32xf32>
    %295 = math.tanh %294 : vector<2x32xf32>
    %296 = vector.extract_strided_slice %281 {offsets = [0, 96], sizes = [2, 32], strides = [1, 1]} : vector<2x128xf32> to vector<2x32xf32>
    %297 = arith.negf %296 : vector<2x32xf32>
    %298 = math.exp %297 : vector<2x32xf32>
    %cst_56 = arith.constant 1.000000e+00 : f32
    %299 = vector.broadcast %cst_56 : f32 to vector<2x32xf32>
    %300 = arith.addf %299, %298 : vector<2x32xf32>
    %301 = arith.divf %299, %300 : vector<2x32xf32>
    %302 = arith.mulf %293, %265 : vector<2x32xf32>
    %303 = arith.mulf %287, %295 : vector<2x32xf32>
    %304 = arith.addf %302, %303 : vector<2x32xf32>
    %305 = math.tanh %304 : vector<2x32xf32>
    %306 = arith.mulf %301, %305 : vector<2x32xf32>
    %cst_57 = arith.constant dense<0.000000e+00> : vector<2x256xf32>
    %307 = tpu.matmul %306, %1, %cst_57 {dimension_numbers = #tpu.dot_dimension_numbers<[1], [0], [0], [1], [0, 0, 1, 1], [], []>} : vector<2x32xf32>, vector<32x256xf32>, vector<2x256xf32> -> vector<2x256xf32>
    %308 = arith.addf %307, %4 : vector<2x256xf32>
    %309 = vector.extract_strided_slice %308 {offsets = [0, 128], sizes = [2, 128], strides = [1, 1]} : vector<2x256xf32> to vector<2x128xf32>
    %c16_i32_58 = arith.constant 16 : i32
    %310 = vector.broadcast %c16_i32_58 : i32 to vector<2x128xi32>
    %311 = arith.cmpi eq, %5, %310 : vector<2x128xi32>
    %312 = arith.negf %309 : vector<2x128xf32>
    %313 = math.exp %312 : vector<2x128xf32>
    %cst_59 = arith.constant 1.000000e+00 : f32
    %314 = vector.broadcast %cst_59 : f32 to vector<2x128xf32>
    %315 = arith.addf %314, %313 : vector<2x128xf32>
    %316 = arith.divf %314, %315 : vector<2x128xf32>
    %317 = arith.select %311, %316, %309 : vector<2x128xi1>, vector<2x128xf32>
    %c0_60 = arith.constant 0 : index
    %c896 = arith.constant 896 : index
    %318 = vector.load %arg3[%c0_60, %c896] : memref<2x1024xf32, #tpu.memory_space<vmem>>, vector<2x128xf32>
    tpu.vector_store %arg3[%c0_60, %c896], %317 {strides = array<i32>} : memref<2x1024xf32, #tpu.memory_space<vmem>>, vector<2x128xf32>,
    return
  }
}

</mosaic_0001>

<bundles_post_ra>
// kernel: pose_model_forward.1
= control target key start
LH: loop header
LB: loop body
LE: loop exit
PB: predicated region body
PF: predicated region fallthrough
CT: control target
= control target key end

     0   :  { %8 = vsyncpa [#allocation3], 0  ;;  %s1143_s12 = smov [#allocation2]   ;;  %s1358_s0 = inlined_call_operand.vmem [shape: f32[2,128], index: 0, kind: input, shape index: {}]   ;;  %s1359_s1 = inlined_call_operand.hbm [shape: f32[32,256], index: 1, kind: input, shape index: {}]   ;;  %s1360_s2 = inlined_call_operand.vmem [shape: f32[1,256], index: 2, kind: input, shape index: {}]   ;;  %s1361_s3 = inlined_call_operand.vmem [shape: f32[2,1024], index: 3, kind: output, shape index: {}]  }
   0x1   :  { %s16_s13 = sshll.u32 %s1143_s12, 4  ;;  %s1119_s16 = scalar_lea.hbm %s1359_s1, 1024  ;;  %s17_s13 = int_to_ptr.vmem [resolvable:$true] %s16_s13 }
   0x2   :  { %p1120_p0 = scmp.ne.s32.totalorder %s1359_s1, %s1119_s16  ;;  %p1123_p1 = scmp.lt.u32.totalorder %s1119_s16, %s1359_s1 }
   0x4   :  { %p1125_p2 = pnand %p1123_p1, %p1120_p0 }
   0x6   :  { %1128 = shalt.err (!%p1125_p2)
}
   0x7   :  { %s1129_s21 = scalar_lea.vmem %s17_s13, 1024  ;;  %p1134_p4 = scmp.lt.s32.totalorder %s17_s13, %s17_s13 }
   0x8   :  { %p1130_p3 = scmp.ne.s32.totalorder %s17_s13, %s1129_s21  ;;  %p1135_p5 = scmp.lt.s32.totalorder %s1129_s21, %s1129_s21 }
   0xa   :  { %p1136_p6 = por %p1135_p5, %p1134_p4 }
   0xc   :  { %p1137_p7 = pnand %p1136_p6, %p1130_p3 }
   0xe   :  { %1140 = shalt.err (!%p1137_p7)
}
   0xf   :  { %s1144_s22 = smov 256   ;;  %s1145_s23 = smov 16  }
  0x10   :  { %22 = dma.hbm_to_vmem [thread:$0]  %s1359_s1, 1024, %s17_s13, [#allocation3], %s1144_s22, %s1144_s22, %s1145_s23  }
  0x11   :  { %1141 = dma.done.wait [#allocation3], 1024  }
  0x12   :  { %1142 = vsyncadd [#allocation3], 4294966272  ;;  %v39_v0 = vlaneseq  ;;  %v1188_v3 = vld [vmem:[%s1358_s0] sm:$0x3]  ;;  %s1146_s1 = smov 64   ;;  %s1147_s0 = smov 32  }
  0x13   :  { %v37_v4 = vld [vmem:[%s1360_s2] sm:$0x3]  ;;  %v30_v17 = vld [vmem:[#allocation2 + $0x8] sm:$0xff]  ;;  %v32_v18 = vld [vmem:[#allocation2 + $0x18] sm:$0xff]  ;;  %v1148_v24 = vmov 0.0   ;;  %vm79_vm0 = vcmask 261120  }
  0x14   :  { %v1182_v1 = vshrl.u32 %v39_v0, 7  ;;  %v29_v19 = vld [vmem:[#allocation2] sm:$0xff]  ;;  %v1202_v20 = vpack.c.bf16 %v32_v18, %v30_v17  ;;  %v31_v21 = vld [vmem:[#allocation2 + $0x10] sm:$0xff]  ;;  %v34_v22 = vld [vmem:[#allocation2 + $0x28] sm:$0xff]  ;;  %146 = vmatprep.mubr.f32.mxu0 %v1148_v24  ;;  %256 = vmatprep.mubr.f32.mxu1 %v1148_v24  ;;  %v1238_v45 = vand.u32 127, %v39_v0 }
  0x15   :  { %v36_v23 = vld [vmem:[#allocation2 + $0x38] sm:$0xff]  ;;  %v1206_v25 = vpack.c.bf16 %v31_v21, %v29_v19  ;;  %v33_v27 = vld [vmem:[#allocation2 + $0x20] sm:$0xff]  ;;  %v35_v28 = vld [vmem:[#allocation2 + $0x30] sm:$0xff] }
  0x16   :  { %v41_v2 = vsub.s32 0, %v1182_v1  ;;  %v1208_v26 = vpack.c.bf16 %v36_v23, %v34_v22  ;;  %954 = vmatprep.subr.bf16.mxu0 %v1202_v20  ;;  %962 = vmatprep.subr.bf16.mxu1 %v1202_v20  ;;  %v1213_v29 = vpack.c.bf16 %v35_v28, %v33_v27  ;;  %v45_v34 = vsub.s32 1, %v1182_v1 }
  0x17   :  { %956 = vmatpush1.bf16.msra.mxu0 %v1206_v25  ;;  %964 = vmatpush1.bf16.msra.mxu1 %v1206_v25  ;;  %vm153_vm1 = vcmp.eq.s32.totalorder %v1238_v45, 16 }
  0x18   :  { %v1193_v5 = vrot.slane %v37_v4, %v41_v2  ;;  %958 = vmatprep.subr.bf16.mxu0 %v1208_v26  ;;  %966 = vmatprep.subr.bf16.mxu1 %v1208_v26  ;;  %v1231_v35 = vrot.slane %v37_v4, %v45_v34 }
  0x1a   :  { %v51_v6 = vadd.f32 %v1193_v5, %v1188_v3 }
  0x1b   :  { %960 = vmatpush1.bf16.msra.mxu0 %v1213_v29  ;;  %968 = vmatpush1.bf16.msra.mxu1 %v1213_v29 }
  0x1c   :  { %1023 = vtanh.f32 %v51_v6  ;;  %v929_v8 = vmul.f32 -1.442695, %v51_v6  ;;  %970 = vmatprep.subr.bf16.mxu0 %v1202_v20  ;;  %978 = vmatprep.subr.bf16.mxu1 %v1202_v20 }
  0x1e   :  { %1025 = vpow2.f32 %v929_v8 }
  0x26   :  { %v1024_v7 = vpop.eup %1023 }
  0x27   :  { %61 = vrot.lane.b32.xlu0 %v1024_v7, %s1146_s1 }
  0x28   :  { %v1026_v9 = vpop.eup %1025 }
  0x29   :  { %v55_v10 = vadd.f32 1.0, %v1026_v9 }
  0x2b   :  { %1027 = vrcp.f32 %v55_v10 }
  0x35   :  { %v1028_v11 = vpop.eup %1027 }
  0x36   :  { %v59_v14 = vmul.f32 0.0, %v1028_v11 }
  0x99   :  { %v62_v12 = vpop.permute.xlu0 %61 }
  0x9a   :  { %v64_v13 = vmul.f32 %v1028_v11, %v62_v12 }
  0x9c   :  { %66 = vrot.lane.b32.xlu0 %v64_v13, %s1147_s0 }
 0x10e   :  { %v67_v15 = vpop.permute.xlu0 %66 }
 0x10f   :  { %v1199_v16 = vadd.f32 %v67_v15, %v59_v14 }
 0x111   :  { %1029 = vtanh.f32 %v1199_v16 }
 0x11b   :  { %v1030_v30 = vpop.eup %1029 }
 0x11c   :  { %72 = vrot.lane.b32.xlu1 %v1030_v30, %s1146_s1 }
 0x18e   :  { %v73_v31 = vpop.permute.xlu1 %72 }
 0x18f   :  { %v75_v32 = vmul.f32 %v1028_v11, %v73_v31 }
 0x191   :  { %77 = vrot.lane.b32.xlu1 %v75_v32, %s1147_s0 }
 0x203   :  { %v78_v33 = vpop.permute.xlu1 %77 }
 0x204   :  { %930 = vmatmul.mubr.msk.f32.vlgmr.msra.gmra.mrb[0].mxu0 %vm79_vm0, %v78_v33 }
 0x205   :  { %972 = vmatpush1.bf16.msra.mxu0 %v1206_v25  ;;  %365 = vmatprep.mubr.f32.mxu0 %v1148_v24 }
 0x206   :  { %974 = vmatprep.subr.bf16.mxu0 %v1208_v26 }
 0x209   :  { %976 = vmatpush1.bf16.msra.mxu0 %v1213_v29 }
 0x20a   :  { %986 = vmatprep.subr.bf16.mxu0 %v1202_v20 }
 0x2d7   :  { %v148_v36 = vpop.f32.mrb[0].mxu0 }
 0x2d8   :  { %v149_v37 = vadd.f32 %v148_v36, %v1193_v5  ;;  %v150_v38 = vpop.f32.mrb[1].mxu0 }
 0x2d9   :  { %v151_v39 = vadd.f32 %v150_v38, %v1231_v35 }
 0x2da   :  { %v162_v40 = vadd.f32 %v149_v37, %v1188_v3 }
 0x2db   :  { %v931_v41 = vmul.f32 -1.442695, %v151_v39 }
 0x2dc   :  { %1031 = vtanh.f32 %v162_v40  ;;  %v932_v48 = vmul.f32 -1.442695, %v162_v40 }
 0x2dd   :  { %1033 = vpow2.f32 %v931_v41 }
 0x2e6   :  { %v1032_v42 = vpop.eup %1031 }
 0x2e7   :  { %v1034_v43 = vpop.eup %1033  ;;  %172 = vrot.lane.b32.xlu0 %v1032_v42, %s1146_s1 }
 0x2e8   :  { %v157_v44 = vadd.f32 1.0, %v1034_v43 }
 0x2ea   :  { %1035 = vrcp.f32 %v157_v44 }
 0x2eb   :  { %1037 = vpow2.f32 %v932_v48 }
 0x2f4   :  { %v1036_v46 = vpop.eup %1035 }
 0x2f5   :  { %v160_v47 = vsel %vm153_vm1, %v1036_v46, %v151_v39  ;;  %v1038_v49 = vpop.eup %1037 }
 0x2f6   :  { %161 = vst [vmem:[%s1361_s3] sm:$0x3] %v160_v47  ;;  %v166_v50 = vadd.f32 1.0, %v1038_v49 }
 0x2f8   :  { %1039 = vrcp.f32 %v166_v50 }
 0x302   :  { %v1040_v51 = vpop.eup %1039 }
 0x303   :  { %v170_v54 = vmul.f32 %v1040_v51, %v1199_v16 }
 0x359   :  { %v173_v52 = vpop.permute.xlu0 %172 }
 0x35a   :  { %v175_v53 = vmul.f32 %v1040_v51, %v173_v52 }
 0x35c   :  { %177 = vrot.lane.b32.xlu1 %v175_v53, %s1147_s0 }
 0x3ce   :  { %v178_v55 = vpop.permute.xlu1 %177 }
 0x3cf   :  { %v180_v56 = vadd.f32 %v178_v55, %v170_v54 }
 0x3d1   :  { %1041 = vtanh.f32 %v180_v56 }
 0x3db   :  { %v1042_v57 = vpop.eup %1041 }
 0x3dc   :  { %183 = vrot.lane.b32.xlu0 %v1042_v57, %s1146_s1 }
 0x44e   :  { %v184_v58 = vpop.permute.xlu0 %183 }
 0x44f   :  { %v186_v59 = vmul.f32 %v1040_v51, %v184_v58 }
 0x451   :  { %188 = vrot.lane.b32.xlu1 %v186_v59, %s1147_s0 }
 0x4c3   :  { %v189_v60 = vpop.permute.xlu1 %188 }
 0x4c4   :  { %933 = vmatmul.mubr.msk.f32.vlgmr.msra.gmra.mrb[0].mxu1 %vm79_vm0, %v189_v60 }
 0x4c5   :  { %980 = vmatpush1.bf16.msra.mxu1 %v1206_v25  ;;  %474 = vmatprep.mubr.f32.mxu1 %v1148_v24 }
 0x4c6   :  { %982 = vmatprep.subr.bf16.mxu1 %v1208_v26 }
 0x4c9   :  { %984 = vmatpush1.bf16.msra.mxu1 %v1213_v29 }
 0x4ca   :  { %994 = vmatprep.subr.bf16.mxu1 %v1202_v20 }
 0x597   :  { %v258_v61 = vpop.f32.mrb[0].mxu1 }
 0x598   :  { %v259_v62 = vadd.f32 %v258_v61, %v1193_v5  ;;  %v260_v63 = vpop.f32.mrb[1].mxu1 }
 0x599   :  { %v261_v0 = vadd.f32 %v260_v63, %v1231_v35 }
 0x59a   :  { %v271_v1 = vadd.f32 %v259_v62, %v1188_v3 }
 0x59b   :  { %v934_v2 = vmul.f32 -1.442695, %v261_v0 }
 0x59c   :  { %1043 = vtanh.f32 %v271_v1  ;;  %v935_v10 = vmul.f32 -1.442695, %v271_v1 }
 0x59d   :  { %1045 = vpow2.f32 %v934_v2 }
 0x5a6   :  { %v1044_v4 = vpop.eup %1043 }
 0x5a7   :  { %v1046_v6 = vpop.eup %1045  ;;  %281 = vrot.lane.b32.xlu0 %v1044_v4, %s1146_s1 }
 0x5a8   :  { %v266_v7 = vadd.f32 1.0, %v1046_v6 }
 0x5aa   :  { %1047 = vrcp.f32 %v266_v7 }
 0x5ab   :  { %1049 = vpow2.f32 %v935_v10 }
 0x5b4   :  { %v1048_v8 = vpop.eup %1047 }
 0x5b5   :  { %v269_v9 = vsel %vm153_vm1, %v1048_v8, %v261_v0  ;;  %v1050_v11 = vpop.eup %1049 }
 0x5b6   :  { %270 = vst [vmem:[%s1361_s3 + $0x2] sm:$0x3] %v269_v9  ;;  %v275_v12 = vadd.f32 1.0, %v1050_v11 }
 0x5b8   :  { %1051 = vrcp.f32 %v275_v12 }
 0x5c2   :  { %v1052_v13 = vpop.eup %1051 }
 0x5c3   :  { %v279_v16 = vmul.f32 %v1052_v13, %v180_v56 }
 0x619   :  { %v282_v14 = vpop.permute.xlu0 %281 }
 0x61a   :  { %v284_v15 = vmul.f32 %v1052_v13, %v282_v14 }
 0x61c   :  { %286 = vrot.lane.b32.xlu1 %v284_v15, %s1147_s0 }
 0x68e   :  { %v287_v17 = vpop.permute.xlu1 %286 }
 0x68f   :  { %v289_v18 = vadd.f32 %v287_v17, %v279_v16 }
 0x691   :  { %1053 = vtanh.f32 %v289_v18 }
 0x69b   :  { %v1054_v19 = vpop.eup %1053 }
 0x69c   :  { %292 = vrot.lane.b32.xlu0 %v1054_v19, %s1146_s1 }
 0x70e   :  { %v293_v21 = vpop.permute.xlu0 %292 }
 0x70f   :  { %v295_v22 = vmul.f32 %v1052_v13, %v293_v21 }
 0x711   :  { %297 = vrot.lane.b32.xlu1 %v295_v22, %s1147_s0 }
 0x783   :  { %v298_v23 = vpop.permute.xlu1 %297 }
 0x784   :  { %936 = vmatmul.mubr.msk.f32.vlgmr.msra.gmra.mrb[2].mxu0 %vm79_vm0, %v298_v23 }
 0x785   :  { %988 = vmatpush1.bf16.msra.mxu0 %v1206_v25  ;;  %583 = vmatprep.mubr.f32.mxu0 %v1148_v24 }
 0x786   :  { %990 = vmatprep.subr.bf16.mxu0 %v1208_v26 }
 0x789   :  { %992 = vmatpush1.bf16.msra.mxu0 %v1213_v29 }
 0x78a   :  { %1002 = vmatprep.subr.bf16.mxu0 %v1202_v20 }
 0x857   :  { %v367_v27 = vpop.f32.mrb[2].mxu0 }
 0x858   :  { %v368_v28 = vadd.f32 %v367_v27, %v1193_v5  ;;  %v369_v30 = vpop.f32.mrb[3].mxu0 }
 0x859   :  { %v370_v31 = vadd.f32 %v369_v30, %v1231_v35 }
 0x85a   :  { %v380_v32 = vadd.f32 %v368_v28, %v1188_v3 }
 0x85b   :  { %v937_v33 = vmul.f32 -1.442695, %v370_v31 }
 0x85c   :  { %1055 = vtanh.f32 %v380_v32  ;;  %v938_v40 = vmul.f32 -1.442695, %v380_v32 }
 0x85d   :  { %1057 = vpow2.f32 %v937_v33 }
 0x866   :  { %v1056_v34 = vpop.eup %1055 }
 0x867   :  { %v1058_v36 = vpop.eup %1057  ;;  %390 = vrot.lane.b32.xlu0 %v1056_v34, %s1146_s1 }
 0x868   :  { %v375_v37 = vadd.f32 1.0, %v1058_v36 }
 0x86a   :  { %1059 = vrcp.f32 %v375_v37 }
 0x86b   :  { %1061 = vpow2.f32 %v938_v40 }
 0x874   :  { %v1060_v38 = vpop.eup %1059 }
 0x875   :  { %v378_v39 = vsel %vm153_vm1, %v1060_v38, %v370_v31  ;;  %v1062_v41 = vpop.eup %1061 }
 0x876   :  { %379 = vst [vmem:[%s1361_s3 + $0x4] sm:$0x3] %v378_v39  ;;  %v384_v42 = vadd.f32 1.0, %v1062_v41 }
 0x878   :  { %1063 = vrcp.f32 %v384_v42 }
 0x882   :  { %v1064_v43 = vpop.eup %1063 }
 0x883   :  { %v388_v47 = vmul.f32 %v1064_v43, %v289_v18 }
 0x8d9   :  { %v391_v44 = vpop.permute.xlu0 %390 }
 0x8da   :  { %v393_v46 = vmul.f32 %v1064_v43, %v391_v44 }
 0x8dc   :  { %395 = vrot.lane.b32.xlu1 %v393_v46, %s1147_s0 }
 0x94e   :  { %v396_v48 = vpop.permute.xlu1 %395 }
 0x94f   :  { %v398_v49 = vadd.f32 %v396_v48, %v388_v47 }
 0x951   :  { %1065 = vtanh.f32 %v398_v49 }
 0x95b   :  { %v1066_v50 = vpop.eup %1065 }
 0x95c   :  { %401 = vrot.lane.b32.xlu0 %v1066_v50, %s1146_s1 }
 0x9ce   :  { %v402_v51 = vpop.permute.xlu0 %401 }
 0x9cf   :  { %v404_v52 = vmul.f32 %v1064_v43, %v402_v51 }
 0x9d1   :  { %406 = vrot.lane.b32.xlu1 %v404_v52, %s1147_s0 }
 0xa43   :  { %v407_v53 = vpop.permute.xlu1 %406 }
 0xa44   :  { %939 = vmatmul.mubr.msk.f32.vlgmr.msra.gmra.mrb[2].mxu1 %vm79_vm0, %v407_v53 }
 0xa45   :  { %996 = vmatpush1.bf16.msra.mxu1 %v1206_v25  ;;  %692 = vmatprep.mubr.f32.mxu1 %v1148_v24 }
 0xa46   :  { %998 = vmatprep.subr.bf16.mxu1 %v1208_v26 }
 0xa49   :  { %1000 = vmatpush1.bf16.msra.mxu1 %v1213_v29 }
 0xa4a   :  { %1010 = vmatprep.subr.bf16.mxu1 %v1202_v20 }
 0xb17   :  { %v476_v54 = vpop.f32.mrb[2].mxu1 }
 0xb18   :  { %v477_v55 = vadd.f32 %v476_v54, %v1193_v5  ;;  %v478_v56 = vpop.f32.mrb[3].mxu1 }
 0xb19   :  { %v479_v57 = vadd.f32 %v478_v56, %v1231_v35 }
 0xb1a   :  { %v489_v58 = vadd.f32 %v477_v55, %v1188_v3 }
 0xb1b   :  { %v940_v59 = vmul.f32 -1.442695, %v479_v57 }
 0xb1c   :  { %1067 = vtanh.f32 %v489_v58  ;;  %v941_v0 = vmul.f32 -1.442695, %v489_v58 }
 0xb1d   :  { %1069 = vpow2.f32 %v940_v59 }
 0xb26   :  { %v1068_v60 = vpop.eup %1067 }
 0xb27   :  { %v1070_v61 = vpop.eup %1069  ;;  %499 = vrot.lane.b32.xlu0 %v1068_v60, %s1146_s1 }
 0xb28   :  { %v484_v62 = vadd.f32 1.0, %v1070_v61 }
 0xb2a   :  { %1071 = vrcp.f32 %v484_v62 }
 0xb2b   :  { %1073 = vpow2.f32 %v941_v0 }
 0xb34   :  { %v1072_v63 = vpop.eup %1071 }
 0xb35   :  { %v487_v20 = vsel %vm153_vm1, %v1072_v63, %v479_v57  ;;  %v1074_v1 = vpop.eup %1073 }
 0xb36   :  { %488 = vst [vmem:[%s1361_s3 + $0x6] sm:$0x3] %v487_v20  ;;  %v493_v2 = vadd.f32 1.0, %v1074_v1 }
 0xb38   :  { %1075 = vrcp.f32 %v493_v2 }
 0xb42   :  { %v1076_v4 = vpop.eup %1075 }
 0xb43   :  { %v497_v8 = vmul.f32 %v1076_v4, %v398_v49 }
 0xb99   :  { %v500_v6 = vpop.permute.xlu0 %499 }
 0xb9a   :  { %v502_v7 = vmul.f32 %v1076_v4, %v500_v6 }
 0xb9c   :  { %504 = vrot.lane.b32.xlu1 %v502_v7, %s1147_s0 }
 0xc0e   :  { %v505_v9 = vpop.permute.xlu1 %504 }
 0xc0f   :  { %v507_v10 = vadd.f32 %v505_v9, %v497_v8 }
 0xc11   :  { %1077 = vtanh.f32 %v507_v10 }
 0xc1b   :  { %v1078_v11 = vpop.eup %1077 }
 0xc1c   :  { %510 = vrot.lane.b32.xlu0 %v1078_v11, %s1146_s1 }
 0xc8e   :  { %v511_v12 = vpop.permute.xlu0 %510 }
 0xc8f   :  { %v513_v13 = vmul.f32 %v1076_v4, %v511_v12 }
 0xc91   :  { %515 = vrot.lane.b32.xlu1 %v513_v13, %s1147_s0 }
 0xd03   :  { %v516_v14 = vpop.permute.xlu1 %515 }
 0xd04   :  { %942 = vmatmul.mubr.msk.f32.vlgmr.msra.gmra.mrb[4].mxu0 %vm79_vm0, %v516_v14 }
 0xd05   :  { %1004 = vmatpush1.bf16.msra.mxu0 %v1206_v25  ;;  %801 = vmatprep.mubr.f32.mxu0 %v1148_v24 }
 0xd06   :  { %1006 = vmatprep.subr.bf16.mxu0 %v1208_v26 }
 0xd09   :  { %1008 = vmatpush1.bf16.msra.mxu0 %v1213_v29 }
 0xdd7   :  { %v585_v15 = vpop.f32.mrb[4].mxu0 }
 0xdd8   :  { %v586_v16 = vadd.f32 %v585_v15, %v1193_v5  ;;  %v587_v17 = vpop.f32.mrb[5].mxu0 }
 0xdd9   :  { %v588_v18 = vadd.f32 %v587_v17, %v1231_v35 }
 0xdda   :  { %v598_v19 = vadd.f32 %v586_v16, %v1188_v3 }
 0xddb   :  { %v943_v21 = vmul.f32 -1.442695, %v588_v18 }
 0xddc   :  { %1079 = vtanh.f32 %v598_v19  ;;  %v944_v31 = vmul.f32 -1.442695, %v598_v19 }
 0xddd   :  { %1081 = vpow2.f32 %v943_v21 }
 0xde6   :  { %v1080_v22 = vpop.eup %1079 }
 0xde7   :  { %v1082_v23 = vpop.eup %1081  ;;  %608 = vrot.lane.b32.xlu0 %v1080_v22, %s1146_s1 }
 0xde8   :  { %v593_v27 = vadd.f32 1.0, %v1082_v23 }
 0xdea   :  { %1083 = vrcp.f32 %v593_v27 }
 0xdeb   :  { %1085 = vpow2.f32 %v944_v31 }
 0xdf4   :  { %v1084_v28 = vpop.eup %1083 }
 0xdf5   :  { %v596_v30 = vsel %vm153_vm1, %v1084_v28, %v588_v18  ;;  %v1086_v32 = vpop.eup %1085 }
 0xdf6   :  { %597 = vst [vmem:[%s1361_s3 + $0x8] sm:$0x3] %v596_v30  ;;  %v602_v33 = vadd.f32 1.0, %v1086_v32 }
 0xdf8   :  { %1087 = vrcp.f32 %v602_v33 }
 0xe02   :  { %v1088_v34 = vpop.eup %1087 }
 0xe03   :  { %v606_v38 = vmul.f32 %v1088_v34, %v507_v10 }
 0xe59   :  { %v609_v36 = vpop.permute.xlu0 %608 }
 0xe5a   :  { %v611_v37 = vmul.f32 %v1088_v34, %v609_v36 }
 0xe5c   :  { %613 = vrot.lane.b32.xlu1 %v611_v37, %s1147_s0 }
 0xece   :  { %v614_v39 = vpop.permute.xlu1 %613 }
 0xecf   :  { %v616_v40 = vadd.f32 %v614_v39, %v606_v38 }
 0xed1   :  { %1089 = vtanh.f32 %v616_v40 }
 0xedb   :  { %v1090_v41 = vpop.eup %1089 }
 0xedc   :  { %619 = vrot.lane.b32.xlu0 %v1090_v41, %s1146_s1 }
 0xf4e   :  { %v620_v42 = vpop.permute.xlu0 %619 }
 0xf4f   :  { %v622_v43 = vmul.f32 %v1088_v34, %v620_v42 }
 0xf51   :  { %624 = vrot.lane.b32.xlu1 %v622_v43, %s1147_s0 }
 0xfc3   :  { %v625_v44 = vpop.permute.xlu1 %624 }
 0xfc4   :  { %945 = vmatmul.mubr.msk.f32.vlgmr.msra.gmra.mrb[4].mxu1 %vm79_vm0, %v625_v44 }
 0xfc5   :  { %1012 = vmatpush1.bf16.msra.mxu1 %v1206_v25  ;;  %910 = vmatprep.mubr.f32.mxu1 %v1148_v24 }
 0xfc6   :  { %1014 = vmatprep.subr.bf16.mxu1 %v1208_v26 }
 0xfc9   :  { %1016 = vmatpush1.bf16.msra.mxu1 %v1213_v29 }
0x1097   :  { %v694_v46 = vpop.f32.mrb[4].mxu1 }
0x1098   :  { %v695_v47 = vadd.f32 %v694_v46, %v1193_v5  ;;  %v696_v48 = vpop.f32.mrb[5].mxu1 }
0x1099   :  { %v697_v49 = vadd.f32 %v696_v48, %v1231_v35 }
0x109a   :  { %v707_v50 = vadd.f32 %v695_v47, %v1188_v3 }
0x109b   :  { %v946_v51 = vmul.f32 -1.442695, %v697_v49 }
0x109c   :  { %1091 = vtanh.f32 %v707_v50  ;;  %v947_v29 = vmul.f32 -1.442695, %v707_v50 }
0x109d   :  { %1093 = vpow2.f32 %v946_v51 }
0x10a6   :  { %v1092_v52 = vpop.eup %1091 }
0x10a7   :  { %v1094_v53 = vpop.eup %1093  ;;  %717 = vrot.lane.b32.xlu0 %v1092_v52, %s1146_s1 }
0x10a8   :  { %v702_v24 = vadd.f32 1.0, %v1094_v53 }
0x10aa   :  { %1095 = vrcp.f32 %v702_v24 }
0x10ab   :  { %1097 = vpow2.f32 %v947_v29 }
0x10b4   :  { %v1096_v25 = vpop.eup %1095 }
0x10b5   :  { %v705_v26 = vsel %vm153_vm1, %v1096_v25, %v697_v49  ;;  %v1098_v54 = vpop.eup %1097 }
0x10b6   :  { %706 = vst [vmem:[%s1361_s3 + $0xa] sm:$0x3] %v705_v26  ;;  %v711_v55 = vadd.f32 1.0, %v1098_v54 }
0x10b8   :  { %1099 = vrcp.f32 %v711_v55 }
0x10c2   :  { %v1100_v56 = vpop.eup %1099 }
0x10c3   :  { %v715_v59 = vmul.f32 %v1100_v56, %v616_v40 }
0x1119   :  { %v718_v57 = vpop.permute.xlu0 %717 }
0x111a   :  { %v720_v58 = vmul.f32 %v1100_v56, %v718_v57 }
0x111c   :  { %722 = vrot.lane.b32.xlu1 %v720_v58, %s1147_s0 }
0x118e   :  { %v723_v60 = vpop.permute.xlu1 %722 }
0x118f   :  { %v725_v61 = vadd.f32 %v723_v60, %v715_v59 }
0x1191   :  { %1101 = vtanh.f32 %v725_v61 }
0x119b   :  { %v1102_v62 = vpop.eup %1101 }
0x119c   :  { %728 = vrot.lane.b32.xlu0 %v1102_v62, %s1146_s1 }
0x120e   :  { %v729_v63 = vpop.permute.xlu0 %728 }
0x120f   :  { %v731_v20 = vmul.f32 %v1100_v56, %v729_v63 }
0x1211   :  { %733 = vrot.lane.b32.xlu1 %v731_v20, %s1147_s0 }
0x1283   :  { %v734_v0 = vpop.permute.xlu1 %733 }
0x1284   :  { %948 = vmatmul.mubr.msk.f32.vlgmr.msra.gmra.mrb[6].mxu0 %vm79_vm0, %v734_v0 }
0x1357   :  { %v803_v1 = vpop.f32.mrb[6].mxu0 }
0x1358   :  { %v804_v2 = vadd.f32 %v803_v1, %v1193_v5  ;;  %v805_v4 = vpop.f32.mrb[7].mxu0 }
0x1359   :  { %v806_v6 = vadd.f32 %v805_v4, %v1231_v35 }
0x135a   :  { %v816_v7 = vadd.f32 %v804_v2, %v1188_v3 }
0x135b   :  { %v949_v8 = vmul.f32 -1.442695, %v806_v6 }
0x135c   :  { %1103 = vtanh.f32 %v816_v7  ;;  %v950_v5 = vmul.f32 -1.442695, %v816_v7 }
0x135d   :  { %1105 = vpow2.f32 %v949_v8 }
0x1366   :  { %v1104_v9 = vpop.eup %1103 }
0x1367   :  { %v1106_v10 = vpop.eup %1105  ;;  %826 = vrot.lane.b32.xlu0 %v1104_v9, %s1146_s1 }
0x1368   :  { %v811_v11 = vadd.f32 1.0, %v1106_v10 }
0x136a   :  { %1107 = vrcp.f32 %v811_v11 }
0x136b   :  { %1109 = vpow2.f32 %v950_v5 }
0x1374   :  { %v1108_v12 = vpop.eup %1107 }
0x1375   :  { %v814_v13 = vsel %vm153_vm1, %v1108_v12, %v806_v6  ;;  %v1110_v3 = vpop.eup %1109 }
0x1376   :  { %815 = vst [vmem:[%s1361_s3 + $0xc] sm:$0x3] %v814_v13  ;;  %v820_v14 = vadd.f32 1.0, %v1110_v3 }
0x1378   :  { %1111 = vrcp.f32 %v820_v14 }
0x1382   :  { %v1112_v15 = vpop.eup %1111 }
0x1383   :  { %v824_v18 = vmul.f32 %v1112_v15, %v725_v61 }
0x13d9   :  { %v827_v16 = vpop.permute.xlu0 %826 }
0x13da   :  { %v829_v17 = vmul.f32 %v1112_v15, %v827_v16 }
0x13dc   :  { %831 = vrot.lane.b32.xlu1 %v829_v17, %s1147_s0 }
0x144e   :  { %v832_v19 = vpop.permute.xlu1 %831 }
0x144f   :  { %v834_v21 = vadd.f32 %v832_v19, %v824_v18 }
0x1451   :  { %1113 = vtanh.f32 %v834_v21 }
0x145b   :  { %v1114_v22 = vpop.eup %1113 }
0x145c   :  { %837 = vrot.lane.b32.xlu0 %v1114_v22, %s1146_s1 }
0x14ce   :  { %v838_v23 = vpop.permute.xlu0 %837 }
0x14cf   :  { %v840_v27 = vmul.f32 %v1112_v15, %v838_v23 }
0x14d1   :  { %842 = vrot.lane.b32.xlu1 %v840_v27, %s1147_s0 }
0x1543   :  { %v843_v28 = vpop.permute.xlu1 %842 }
0x1544   :  { %951 = vmatmul.mubr.msk.f32.vlgmr.msra.gmra.mrb[6].mxu1 %vm79_vm0, %v843_v28 }
0x1617   :  { %v912_v30 = vpop.f32.mrb[6].mxu1 }
0x1618   :  { %v913_v31 = vpop.f32.mrb[7].mxu1 }
0x1619   :  { %v914_v32 = vadd.f32 %v913_v31, %v1231_v35 }
0x161b   :  { %v952_v33 = vmul.f32 -1.442695, %v914_v32 }
0x161d   :  { %1115 = vpow2.f32 %v952_v33 }
0x1627   :  { %v1116_v34 = vpop.eup %1115 }
0x1628   :  { %v919_v36 = vadd.f32 1.0, %v1116_v34 }
0x162a   :  { %1117 = vrcp.f32 %v919_v36 }
0x1634   :  { %v1118_v37 = vpop.eup %1117 }
0x1635   :  { %v922_v38 = vsel %vm153_vm1, %v1118_v37, %v914_v32 }
0x1636   :  { %923 = vst [vmem:[%s1361_s3 + $0xe] sm:$0x3] %v922_v38 }
0x1637   :  { %928 = vsyncpa [#allocation3], 1 }

</bundles_post_ra>
